<compile_context>
chip_gen: v5e
topology: v5e:2x2
jax: 0.10.0
libtpu: 0.0.40
codegen_flags: <defaults>
</compile_context>

<pallas_src>
import jax
import jax.numpy as jnp
from jax.experimental import pallas as pl
from jax.experimental.pallas import tpu as pltpu


def _mlp_kernel(x_ref, w1_ref, b1_ref, w2_ref, b2_ref, o_ref):
    # Fused two-layer MLP with tanh activations, all in VMEM (MXU + EUP).
    x = x_ref[...]
    h = jnp.dot(x, w1_ref[...], preferred_element_type=jnp.float32) + b1_ref[...]
    h = jnp.tanh(h).astype(w2_ref.dtype)            # tanh in f32 (safe on v5e too)
    out = jnp.dot(h, w2_ref[...], preferred_element_type=jnp.float32) + b2_ref[...]
    o_ref[...] = jnp.tanh(out).astype(o_ref.dtype)  # narrow/cast only at the store


def _round_up(x, m):
    return (x + m - 1) // m * m


def _pick_tile(tile_b, B, n_input, hidden, sublane, in_bytes, out_bytes):
    """Batch tile: multiple of the sublane packing, clamped to batch and VMEM."""
    tb = min(tile_b, _round_up(B, sublane))
    tb = _round_up(max(tb, sublane), sublane)
    try:
        vmem_cap = pltpu.get_tpu_info().vmem_capacity_bytes
    except Exception:  # pragma: no cover - fall back to v7x per-TC size
        vmem_cap = 64 << 20
    # Stay well under the scoped-VMEM default (conservative: 1/4 of physical).
    budget = min(vmem_cap, 128 << 20) // 4
    weight_bytes = 2 * ((n_input + hidden) * hidden * in_bytes + 2 * hidden * 4)
    per_row = 2 * (n_input * in_bytes + hidden * out_bytes)  # double-buffered in+out
    max_rows = max(sublane, (budget - weight_bytes) // max(per_row, 1))
    max_rows = max(sublane, (max_rows // sublane) * sublane)
    return min(tb, max_rows)


def net_forward(obs, params, state=None, *, tile_b=4096, use_bf16=False):
    """Equivalent of Net.forward: returns (logits, state)."""
    w1, b1, w2, b2 = params
    B, n_input = obs.shape
    hidden = w2.shape[1]

    in_dtype = jnp.bfloat16 if use_bf16 else jnp.float32
    out_dtype = jnp.bfloat16 if use_bf16 else jnp.float32
    in_bytes = jnp.dtype(in_dtype).itemsize
    out_bytes = jnp.dtype(out_dtype).itemsize
    sublane = 16 if in_dtype == jnp.bfloat16 else 8

    obs_c = obs.astype(in_dtype)
    w1_c = w1.astype(in_dtype)
    w2_c = w2.astype(in_dtype)
    b1_c = b1.astype(jnp.float32)   # biases stay f32: added to the f32 accumulator
    b2_c = b2.astype(jnp.float32)

    tb = _pick_tile(tile_b, B, n_input, hidden, sublane, in_bytes, out_bytes)
    grid = (pl.cdiv(B, tb),)        # ragged last block handled by Pallas masking

    flops = 2 * B * (n_input * hidden + hidden * hidden)
    transcendentals = 2 * B * hidden
    bytes_accessed = (
        B * n_input * in_bytes
        + B * hidden * out_bytes
        + (n_input * hidden + hidden * hidden) * in_bytes
        + 2 * hidden * 4
    )

    logits = pl.pallas_call(
        _mlp_kernel,
        out_shape=jax.ShapeDtypeStruct((B, hidden), out_dtype),
        grid=grid,
        in_specs=[
            pl.BlockSpec((tb, n_input), lambda i: (i, 0)),       # obs tile (pipelined)
            pl.BlockSpec((n_input, hidden), lambda i: (0, 0)),   # w1 resident
            pl.BlockSpec((1, hidden), lambda i: (0, 0)),         # b1 resident
            pl.BlockSpec((hidden, hidden), lambda i: (0, 0)),    # w2 resident
            pl.BlockSpec((1, hidden), lambda i: (0, 0)),         # b2 resident
        ],
        out_specs=pl.BlockSpec((tb, hidden), lambda i: (i, 0)),
        compiler_params=pltpu.CompilerParams(
            dimension_semantics=("parallel",),
        ),
        cost_estimate=pl.CostEstimate(
            flops=flops,
            transcendentals=transcendentals,
            bytes_accessed=bytes_accessed,
        ),
    )(obs_c, w1_c, b1_c, w2_c, b2_c)

    return logits, state


def init_params(key, n_input, hidden=64):
    """Deterministic init mirroring torch.nn.Linear default (uniform +/- 1/sqrt(fan_in))."""
    k1, k2, k3, k4 = jax.random.split(key, 4)
    lim1 = 1.0 / jnp.sqrt(jnp.float32(n_input))
    lim2 = 1.0 / jnp.sqrt(jnp.float32(hidden))
    w1 = jax.random.uniform(k1, (n_input, hidden), jnp.float32, -lim1, lim1)
    b1 = jax.random.uniform(k2, (1, hidden), jnp.float32, -lim1, lim1)
    w2 = jax.random.uniform(k3, (hidden, hidden), jnp.float32, -lim2, lim2)
    b2 = jax.random.uniform(k4, (1, hidden), jnp.float32, -lim2, lim2)
    return w1, b1, w2, b2


def _reference(obs, params):
    w1, b1, w2, b2 = params
    return jnp.tanh(jnp.tanh(obs @ w1 + b1) @ w2 + b2)


if __name__ == "__main__":
    key = jax.random.PRNGKey(0)
    k_obs, k_par, k_obs2, k_obs3 = jax.random.split(key, 4)

    # obs_space.shape = (16,)  ->  n_input = 16 ; batch = 8 (small toy size)
    batch, n_input, hidden = 8, 16, 64
    obs = jax.random.normal(k_obs, (batch, n_input), dtype=jnp.float32)
    params = init_params(k_par, n_input, hidden)

    logits, state = net_forward(obs, params, state=None)
    logits = jax.block_until_ready(logits)
    ref = _reference(obs, params)
    assert logits.shape == (batch, hidden)
    assert logits.dtype == jnp.float32
    assert jnp.allclose(logits, ref, atol=1e-5, rtol=1e-5)
    assert state is None

    # Ragged-grid path: batch not a multiple of the tile, no wrapper pad/slice
    # (grid = (5,), last block has 44 valid rows and is masked on writeback).
    batch2 = 300
    obs2 = jax.random.normal(k_obs2, (batch2, n_input), dtype=jnp.float32)
    logits2, _ = net_forward(obs2, params, state=None, tile_b=64)
    logits2 = jax.block_until_ready(logits2)
    ref2 = _reference(obs2, params)
    assert logits2.shape == (batch2, hidden)
    assert jnp.allclose(logits2, ref2, atol=1e-5, rtol=1e-5)

    # bf16 I/O path (v6e/v7x bandwidth saver): relaxed tolerance vs f32 ref.
    batch3 = 256
    obs3 = jax.random.normal(k_obs3, (batch3, n_input), dtype=jnp.float32)
    logits3, _ = net_forward(obs3, params, state=None, tile_b=128, use_bf16=True)
    logits3 = jax.block_until_ready(logits3)
    ref3 = _reference(obs3, params)
    assert logits3.shape == (batch3, hidden)
    assert logits3.dtype == jnp.bfloat16
    assert jnp.allclose(logits3.astype(jnp.float32), ref3, atol=3e-2, rtol=3e-2)

    print("KERNEL_OK")
</pallas_src>

<mosaic_0001>
module attributes {stable_mosaic.version = 11 : i64} {
  func.func @_mlp_kernel(%arg0: i32, %arg1: memref<8x16xf32, #tpu.memory_space<vmem>>, %arg2: memref<16x64xf32, #tpu.memory_space<vmem>>, %arg3: memref<1x64xf32, #tpu.memory_space<vmem>>, %arg4: memref<64x64xf32, #tpu.memory_space<vmem>>, %arg5: memref<1x64xf32, #tpu.memory_space<vmem>>, %arg6: memref<8x64xf32, #tpu.memory_space<vmem>>) attributes {dimension_semantics = [#tpu.dimension_semantics<parallel>], iteration_bounds = array<i64: 1>, scalar_prefetch = 0 : i64, scratch_operands = 0 : i64, tpu.core_type = #tpu.core_type<tc>, window_params = [{transform_indices = @transform_0, window_bounds = array<i64: 8, 16>}, {pipeline_mode = #tpu.pipeline_mode<synchronous>, transform_indices = @transform_1, window_bounds = array<i64: 16, 64>}, {pipeline_mode = #tpu.pipeline_mode<synchronous>, transform_indices = @transform_2, window_bounds = array<i64: 1, 64>}, {pipeline_mode = #tpu.pipeline_mode<synchronous>, transform_indices = @transform_3, window_bounds = array<i64: 64, 64>}, {pipeline_mode = #tpu.pipeline_mode<synchronous>, transform_indices = @transform_4, window_bounds = array<i64: 1, 64>}, {transform_indices = @transform_5, window_bounds = array<i64: 8, 64>}]} {
    %c0 = arith.constant 0 : index
    %c0_0 = arith.constant 0 : index
    %0 = vector.load %arg1[%c0, %c0_0] : memref<8x16xf32, #tpu.memory_space<vmem>>, vector<8x16xf32>
    %c0_1 = arith.constant 0 : index
    %c0_2 = arith.constant 0 : index
    %1 = vector.load %arg2[%c0_1, %c0_2] : memref<16x64xf32, #tpu.memory_space<vmem>>, vector<16x64xf32>
    %cst = arith.constant dense<0.000000e+00> : vector<8x64xf32>
    %2 = tpu.matmul %0, %1, %cst {dimension_numbers = #tpu.dot_dimension_numbers<[1], [0], [0], [1], [0, 0, 1, 1], [], []>} : vector<8x16xf32>, vector<16x64xf32>, vector<8x64xf32> -> vector<8x64xf32>
    %c0_3 = arith.constant 0 : index
    %c0_4 = arith.constant 0 : index
    %3 = vector.load %arg3[%c0_3, %c0_4] : memref<1x64xf32, #tpu.memory_space<vmem>>, vector<1x64xf32>
    %4 = vector.broadcast %3 : vector<1x64xf32> to vector<8x64xf32>
    %5 = arith.addf %2, %4 : vector<8x64xf32>
    %6 = math.tanh %5 : vector<8x64xf32>
    %c0_5 = arith.constant 0 : index
    %c0_6 = arith.constant 0 : index
    %7 = vector.load %arg4[%c0_5, %c0_6] : memref<64x64xf32, #tpu.memory_space<vmem>>, vector<64x64xf32>
    %cst_7 = arith.constant dense<0.000000e+00> : vector<8x64xf32>
    %8 = tpu.matmul %6, %7, %cst_7 {dimension_numbers = #tpu.dot_dimension_numbers<[1], [0], [0], [1], [0, 0, 1, 1], [], []>} : vector<8x64xf32>, vector<64x64xf32>, vector<8x64xf32> -> vector<8x64xf32>
    %c0_8 = arith.constant 0 : index
    %c0_9 = arith.constant 0 : index
    %9 = vector.load %arg5[%c0_8, %c0_9] : memref<1x64xf32, #tpu.memory_space<vmem>>, vector<1x64xf32>
    %10 = vector.broadcast %9 : vector<1x64xf32> to vector<8x64xf32>
    %11 = arith.addf %8, %10 : vector<8x64xf32>
    %12 = math.tanh %11 : vector<8x64xf32>
    %c0_10 = arith.constant 0 : index
    %c0_11 = arith.constant 0 : index
    %13 = vector.load %arg6[%c0_10, %c0_11] : memref<8x64xf32, #tpu.memory_space<vmem>>, vector<8x64xf32>
    tpu.vector_store %arg6[%c0_10, %c0_11], %12 {strides = array<i32>} : memref<8x64xf32, #tpu.memory_space<vmem>>, vector<8x64xf32>,
    return
  }
  func.func @transform_0(%arg0: i32) -> (i32, i32) {
    %c0_i32 = arith.constant 0 : i32
    %c0_i32_0 = arith.constant 0 : i32
    return %arg0, %c0_i32 : i32, i32
  }
  func.func @transform_1(%arg0: i32) -> (i32, i32) {
    %c0_i32 = arith.constant 0 : i32
    %c0_i32_0 = arith.constant 0 : i32
    %c0_i32_1 = arith.constant 0 : i32
    return %c0_i32, %c0_i32_0 : i32, i32
  }
  func.func @transform_2(%arg0: i32) -> (i32, i32) {
    %c0_i32 = arith.constant 0 : i32
    %c0_i32_0 = arith.constant 0 : i32
    %c0_i32_1 = arith.constant 0 : i32
    return %c0_i32, %c0_i32_0 : i32, i32
  }
  func.func @transform_3(%arg0: i32) -> (i32, i32) {
    %c0_i32 = arith.constant 0 : i32
    %c0_i32_0 = arith.constant 0 : i32
    %c0_i32_1 = arith.constant 0 : i32
    return %c0_i32, %c0_i32_0 : i32, i32
  }
  func.func @transform_4(%arg0: i32) -> (i32, i32) {
    %c0_i32 = arith.constant 0 : i32
    %c0_i32_0 = arith.constant 0 : i32
    %c0_i32_1 = arith.constant 0 : i32
    return %c0_i32, %c0_i32_0 : i32, i32
  }
  func.func @transform_5(%arg0: i32) -> (i32, i32) {
    %c0_i32 = arith.constant 0 : i32
    %c0_i32_0 = arith.constant 0 : i32
    return %arg0, %c0_i32 : i32, i32
  }
}

</mosaic_0001>

<bundles_post_ra>
// kernel: tpu_custom_call.1
= control target key start
LH: loop header
LB: loop body
LE: loop exit
PB: predicated region body
PF: predicated region fallthrough
CT: control target
= control target key end

     0   :  { %10 = vsyncpa [#allocation3], 0  ;;  %s324_s0 = inlined_call_operand.hbm [shape: f32[8,16], index: 0, kind: input, shape index: {}]   ;;  %s325_s1 = inlined_call_operand.hbm [shape: f32[16,64], index: 1, kind: input, shape index: {}]   ;;  %s326_s2 = inlined_call_operand.vmem [shape: f32[1,64], index: 2, kind: input, shape index: {}]   ;;  %s327_s3 = inlined_call_operand.hbm [shape: f32[64,64], index: 3, kind: input, shape index: {}]   ;;  %s328_s4 = inlined_call_operand.vmem [shape: f32[1,64], index: 4, kind: input, shape index: {}]   ;;  %s329_s5 = inlined_call_operand.hbm [shape: f32[8,64], index: 5, kind: output, shape index: {}]  }
   0x1   :  { %11 = vsyncpa [#allocation6], 0  ;;  %s28_s20 = sshll.u32 %s325_s1, 4  ;;  %s29_s20 = int_to_ptr.hbm [resolvable:$true] %s28_s20 }
   0x2   :  { %12 = vsyncpa [#allocation4], 0  ;;  %s270_s21 = smov [#allocation5]   ;;  %s18_s25 = sshll.u32 %s324_s0, 4  ;;  %s19_s25 = int_to_ptr.hbm [resolvable:$true] %s18_s25 }
   0x3   :  { %s30_s22 = sshll.u32 %s270_s21, 4  ;;  %s271_s26 = smov 128   ;;  %s31_s22 = int_to_ptr.vmem [resolvable:$true] %s30_s22 }
   0x4   :  { %s272_s27 = smov 8   ;;  %s273_s28 = smov [#allocation2]  }
   0x5   :  { %36 = dma.hbm_to_vmem [thread:$0]  %s29_s20, 256, %s31_s22, [#allocation6], %s271_s26, %s271_s26, %s272_s27  }
   0x6   :  { %s20_s29 = sshll.u32 %s273_s28, 4  ;;  %s43_s7 = sshll.u32 %s327_s3, 4  ;;  %s21_s29 = int_to_ptr.vmem [resolvable:$true] %s20_s29  ;;  %s44_s7 = int_to_ptr.hbm [resolvable:$true] %s43_s7 }
   0x7   :  { %23 = dma.hbm_to_vmem [thread:$0]  %s19_s25, 128, %s21_s29, [#allocation3]  }
   0x8   :  { %s274_s1 = smov [#allocation7]  }
   0x9   :  { %s45_s8 = sshll.u32 %s274_s1, 4  ;;  %s46_s8 = int_to_ptr.vmem [resolvable:$true] %s45_s8 }
   0xa   :  { %51 = dma.hbm_to_vmem [thread:$0]  %s44_s7, 1024, %s46_s8, [#allocation6], %s271_s26, %s271_s26, %s272_s27  }
   0xb   :  { %264 = dma.done.wait [#allocation3], 128  }
   0xc   :  { %265 = vsyncadd [#allocation3], 4294967168 }
   0xd   :  { %266 = dma.done.wait [#allocation6], 1280  }
   0xe   :  { %267 = vsyncadd [#allocation6], 4294966016  ;;  %v68_v0 = vld [vmem:[#allocation5 + $0x8] sm:$0xff]  ;;  %v67_v1 = vld [vmem:[#allocation5] sm:$0xff]  ;;  %vm73_vm0 = vcmask 130048   ;;  %vm110_vm1 = vcmask 523264  }
   0xf   :  { %91 = vmatpush.msra.mxu0 %v68_v0  ;;  %v66_v2 = vld [vmem:[#allocation2] sm:$0xff]  ;;  %v105_v3 = vld [vmem:[#allocation7 + $0x38] sm:$0xff]  ;;  %v104_v4 = vld [vmem:[#allocation7 + $0x30] sm:$0xff]  ;;  %s275_s11 = smov [#allocation8]   ;;  %s143_s15 = sshll.u32 %s329_s5, 4  ;;  %s144_s15 = int_to_ptr.hbm [resolvable:$true] %s143_s15 }
  0x10   :  { %122 = vmatpush.msra.mxu1 %v105_v3  ;;  %v103_v5 = vld [vmem:[#allocation7 + $0x28] sm:$0xff]  ;;  %v102_v6 = vld [vmem:[#allocation7 + $0x20] sm:$0xff]  ;;  %v101_v7 = vld [vmem:[#allocation7 + $0x18] sm:$0xff]  ;;  %s141_s12 = sshll.u32 %s275_s11, 4  ;;  %s142_s12 = int_to_ptr.vmem [resolvable:$true] %s141_s12 }
  0x11   :  { %92 = vmatpush.msra.mxu0 %v67_v1  ;;  %v100_v8 = vld [vmem:[#allocation7 + $0x10] sm:$0xff]  ;;  %v99_v9 = vld [vmem:[#allocation7 + $0x8] sm:$0xff]  ;;  %v98_v10 = vld [vmem:[#allocation7] sm:$0xff] }
  0x12   :  { %154 = vmatmul.msk.f32.vlgmr.msra.gmra.mxu0 %vm73_vm0, %v66_v2  ;;  %123 = vmatpush.msra.mxu1 %v104_v4  ;;  %v162_v11 = vld [vmem:[%s326_s2] ss:$0 sm:$0xff] }
  0x13   :  { %v163_v15 = vld [vmem:[%s328_s4] ss:$0 sm:$0xff] }
  0x14   :  { %124 = vmatpush.msra.mxu1 %v103_v5 }
  0x16   :  { %125 = vmatpush.msra.mxu1 %v102_v6 }
  0x18   :  { %126 = vmatpush.msra.mxu1 %v101_v7 }
  0x1a   :  { %127 = vmatpush.msra.mxu1 %v100_v8 }
  0x1c   :  { %128 = vmatpush.msra.mxu1 %v99_v9 }
  0x1e   :  { %129 = vmatpush.msra.mxu1 %v98_v10 }
  0x8f   :  { %v94_v12 = vpop.f32.mrf.mxu0 }
  0x90   :  { %v95_v13 = vadd.f32 %v162_v11, %v94_v12 }
  0x92   :  { %164 = vtanh.f32 %v95_v13 }
  0x98   :  { %v165_v14 = vpop.eup %164 }
  0x99   :  { %155 = vmatmul.msk.f32.vlgmr.msra.gmra.mxu1 %vm110_vm1, %v165_v14 }
 0x116   :  { %v131_v16 = vpop.f32.mrf.mxu1 }
 0x117   :  { %v132_v17 = vadd.f32 %v163_v15, %v131_v16 }
 0x119   :  { %166 = vtanh.f32 %v132_v17 }
 0x11f   :  { %v167_v18 = vpop.eup %166 }
 0x120   :  { %135 = vst.msk [vmem:[#allocation8] sm:$0xff] %vm110_vm1, %v167_v18 }
 0x121   :  { %146 = dma.vmem_to_hbm [thread:$0]  %s142_s12, 128, %s144_s15, [#allocation4]  }
 0x122   :  { %268 = dma.done.wait [#allocation4], 128  }
 0x123   :  { %269 = vsyncadd [#allocation4], 4294967168 }
 0x124   :  { %151 = vsyncpa [#allocation3], 1 }
 0x125   :  { %152 = vsyncpa [#allocation6], 1 }
 0x126   :  { %153 = vsyncpa [#allocation4], 1 }

</bundles_post_ra>
